<compile_context>
chip_gen: v5e
topology: v5e:2x2
jax: 0.10.0
libtpu: 0.0.40
codegen_flags: <defaults>
</compile_context>

<pallas_src>
import functools

import jax
import jax.numpy as jnp
from jax.experimental import pallas as pl
from jax.experimental.pallas import tpu as pltpu


CPAD = 32            # padded channel count (sublane axis); > max(in, hidden, out)
BIAS_ROW = CPAD - 1  # accumulator row forced to 1.0 so W_aug's bias column adds b


def _round_up(x, m):
    return ((x + m - 1) // m) * m


def _vmem_budget_bytes():
    """~75% of this generation's physical VMEM (v5e/v6e 128 MiB, v7x 64 MiB)."""
    cap = 64 << 20
    try:
        cap = int(getattr(pltpu.get_tpu_info(), "vmem_capacity_bytes", cap))
    except Exception:
        pass
    cap = max(32 << 20, min(cap, 128 << 20))
    return (cap * 3) // 4


# -----------------------------------------------------------------------------
# Shared per-layer epilogue: bias fold + bf16 projection + activation.
# Output stays [CPAD, tile] -> lane-dense stores, no masked vst.
# -----------------------------------------------------------------------------
def _project_activate(acc_f32, w_ref, activation, out_dtype):
    row = jax.lax.broadcasted_iota(jnp.int32, acc_f32.shape, 0)
    acc = jnp.where(row == BIAS_ROW, 1.0, acc_f32).astype(jnp.bfloat16)
    z = jnp.dot(w_ref[...], acc, preferred_element_type=jnp.float32)
    if activation == "relu":
        z = jnp.maximum(z, 0.0)
    else:  # "sigmoid"
        z = jax.nn.sigmoid(z)
    return z.astype(out_dtype)


# -----------------------------------------------------------------------------
# Fused 3-layer kernel: everything (incl. A_hat^T) VMEM-resident, A read once.
# -----------------------------------------------------------------------------
def _gcn_fused_kernel(x_ref, a_ref, w1_ref, w2_ref, w3_ref, o_ref):
    a = a_ref[...]                                           # resident A_hat^T (bf16)
    h = _project_activate(
        jnp.dot(x_ref[...], a, preferred_element_type=jnp.float32),
        w1_ref, "relu", jnp.bfloat16)
    h = _project_activate(
        jnp.dot(h, a, preferred_element_type=jnp.float32),
        w2_ref, "relu", jnp.bfloat16)
    o_ref[...] = _project_activate(
        jnp.dot(h, a, preferred_element_type=jnp.float32),
        w3_ref, "sigmoid", o_ref.dtype)


def _gcn_fused(xt, a_t, w1, w2, w3, vmem_limit):
    npad = a_t.shape[0]
    flops = 3 * (2 * CPAD * npad * npad + 2 * CPAD * CPAD * npad)
    bytes_accessed = (npad * npad * 2          # A_hat^T read once
                      + CPAD * npad * 2        # X^T
                      + CPAD * npad * 4        # output
                      + 3 * CPAD * CPAD * 2)   # weights
    vmem_spec = pl.BlockSpec(memory_space=pltpu.MemorySpace.VMEM)
    return pl.pallas_call(
        _gcn_fused_kernel,
        out_shape=jax.ShapeDtypeStruct((CPAD, npad), jnp.float32),
        in_specs=[vmem_spec] * 5,
        out_specs=vmem_spec,
        compiler_params=pltpu.CompilerParams(vmem_limit_bytes=int(vmem_limit)),
        cost_estimate=pl.CostEstimate(flops=int(flops),
                                      transcendentals=int(CPAD * npad),
                                      bytes_accessed=int(bytes_accessed)),
    )(xt, a_t, w1, w2, w3)


# -----------------------------------------------------------------------------
# Tiled single-layer kernel (fallback for graphs whose A does not fit VMEM).
#   grid = (j: output node tile [parallel], k: contraction node tile [arbitrary])
#   acc[c, j] += H_in^T[c, k_tile] @ A_hat^T[k_tile, j_tile]   (bf16 -> f32)
#   at last k: z = W_aug^T @ acc_aug (bias column folded), activation, store.
# H_in^T is fully VMEM-resident (constant index_map); only A is streamed.
# -----------------------------------------------------------------------------
def _gcn_layer_kernel(hin_ref, a_ref, w_ref, out_ref, acc_ref, *, activation, tile):
    k = pl.program_id(1)

    @pl.when(k == 0)
    def _():
        acc_ref[...] = jnp.zeros_like(acc_ref)

    ks = pl.multiple_of(k * tile, tile)
    acc_ref[...] += jnp.dot(hin_ref[:, pl.ds(ks, tile)], a_ref[...],
                            preferred_element_type=jnp.float32)

    @pl.when(k == pl.num_programs(1) - 1)
    def _():
        out_ref[...] = _project_activate(acc_ref[...], w_ref, activation,
                                         out_ref.dtype)


def _gcn_layer(hin, a_t, w_aug, *, activation, out_dtype, tile, vmem_limit):
    """hin: [CPAD, Npad] bf16 (H_in^T), a_t: [Npad, Npad] bf16 (A_hat^T),
    w_aug: [CPAD, CPAD] bf16 (bias folded)."""
    npad = a_t.shape[0]
    nj = npad // tile
    nk = npad // tile

    flops = 2 * CPAD * npad * npad + 2 * CPAD * CPAD * npad
    bytes_accessed = (npad * npad * 2                        # A_hat^T (bf16), once
                      + CPAD * npad * 2                      # H_in^T resident, once
                      + CPAD * npad * jnp.dtype(out_dtype).itemsize
                      + CPAD * CPAD * 2)                     # W_aug (bf16)
    transcendentals = CPAD * npad if activation == "sigmoid" else 0

    kernel = functools.partial(_gcn_layer_kernel, activation=activation, tile=tile)
    return pl.pallas_call(
        kernel,
        out_shape=jax.ShapeDtypeStruct((CPAD, npad), out_dtype),
        grid=(nj, nk),
        in_specs=[
            pl.BlockSpec((CPAD, npad), lambda j, k: (0, 0)),   # H_in^T (resident)
            pl.BlockSpec((tile, tile), lambda j, k: (k, j)),   # A_hat^T tile
            pl.BlockSpec((CPAD, CPAD), lambda j, k: (0, 0)),   # W_aug^T (bf16)
        ],
        out_specs=pl.BlockSpec((CPAD, tile), lambda j, k: (0, j)),
        scratch_shapes=[pltpu.VMEM((CPAD, tile), jnp.float32)],
        compiler_params=pltpu.CompilerParams(
            dimension_semantics=("parallel", "arbitrary"),
            vmem_limit_bytes=int(vmem_limit)),
        cost_estimate=pl.CostEstimate(flops=int(flops),
                                      transcendentals=int(transcendentals),
                                      bytes_accessed=int(bytes_accessed)),
    )(hin, a_t, w_aug)


# -----------------------------------------------------------------------------
# Glue: normalized adjacency (PyG gcn_norm semantics) and weight packing.
# -----------------------------------------------------------------------------
def normalized_adjacency(edge_index, num_nodes):
    """Reference orientation A_hat[dst, src], f32, unpadded (explicit self
    loops are replaced by a single weight-1 loop)."""
    src, dst = edge_index[0], edge_index[1]
    adj = jnp.zeros((num_nodes, num_nodes), jnp.float32).at[dst, src].add(1.0)
    eye = jnp.eye(num_nodes, dtype=jnp.float32)
    adj = adj * (1.0 - eye) + eye
    deg = jnp.sum(adj, axis=1)
    d = jnp.where(deg > 0.0, jax.lax.rsqrt(deg), 0.0)
    return d[:, None] * adj * d[None, :]


def normalized_adjacency_t_padded(edge_index, num_nodes, npad, dtype=jnp.bfloat16):
    """A_hat^T built directly at the padded size and emitted in `dtype` in one
    pass.  A_hat^T[src, dst] = d^-1/2[src] * A[dst, src] * d^-1/2[dst]."""
    src, dst = edge_index[0], edge_index[1]
    at = jnp.zeros((npad, npad), jnp.float32).at[src, dst].add(1.0)   # A^T
    i = jnp.arange(npad)
    on_diag = i[:, None] == i[None, :]
    real = (i < num_nodes).astype(jnp.float32)
    at = jnp.where(on_diag, real[None, :], at)   # weight-1 self loops, real nodes
    deg = jnp.sum(at, axis=0)                    # in-degree (+ self loop) per node
    d = jnp.where(deg > 0.0, jax.lax.rsqrt(deg), 0.0)
    return (d[:, None] * at * d[None, :]).astype(dtype)


def _pack_w(w, b):
    """[in,out] weight + [out] bias -> padded, transposed, bias-augmented
    [CPAD, CPAD] bf16 (bias lives in column BIAS_ROW)."""
    cin, cout = w.shape
    wt = jnp.zeros((CPAD, CPAD), jnp.float32)
    wt = wt.at[:cout, :cin].set(w.T)
    wt = wt.at[:cout, BIAS_ROW].set(b.reshape(-1))
    return wt.astype(jnp.bfloat16)


def gcn_forward_pallas(x, edge_index, params, *, tile=512, force_tiled=False):
    w1, b1, w2, b2, w3, b3 = params
    n, cin = x.shape
    out_c = w3.shape[1]
    budget = _vmem_budget_bytes()

    # Fused (A-resident) path if the whole problem fits this chip's VMEM.
    npad_fused = _round_up(n, 128)
    fused_bytes = 2 * npad_fused * npad_fused + 16 * CPAD * npad_fused + (2 << 20)
    use_fused = (not force_tiled) and (fused_bytes <= budget)

    npad = npad_fused if use_fused else _round_up(n, tile)

    a_t = normalized_adjacency_t_padded(edge_index, n, npad, jnp.bfloat16)
    xt = jnp.zeros((CPAD, npad), jnp.bfloat16).at[:cin, :n].set(
        x.astype(jnp.bfloat16).T)
    w1a, w2a, w3a = _pack_w(w1, b1), _pack_w(w2, b2), _pack_w(w3, b3)

    if use_fused:
        o = _gcn_fused(xt, a_t, w1a, w2a, w3a, budget)
    else:
        h = _gcn_layer(xt, a_t, w1a, activation="relu",
                       out_dtype=jnp.bfloat16, tile=tile, vmem_limit=budget)
        h = _gcn_layer(h, a_t, w2a, activation="relu",
                       out_dtype=jnp.bfloat16, tile=tile, vmem_limit=budget)
        o = _gcn_layer(h, a_t, w3a, activation="sigmoid",
                       out_dtype=jnp.float32, tile=tile, vmem_limit=budget)
    return o[:out_c, :n].T.astype(jnp.float32)     # [N, out_channels]


# -----------------------------------------------------------------------------
# Parameters / model wrapper / pure-JAX reference.
# -----------------------------------------------------------------------------
def init_params(key, in_channels=4, hidden_channels=16, out_channels=1):
    k1, k2, k3, kb1, kb2, kb3 = jax.random.split(key, 6)

    def glorot(k, fan_in, fan_out):
        limit = jnp.sqrt(6.0 / (fan_in + fan_out))
        return jax.random.uniform(k, (fan_in, fan_out), jnp.float32, -limit, limit)

    w1 = glorot(k1, in_channels, hidden_channels)
    b1 = 0.1 * jax.random.normal(kb1, (hidden_channels,), jnp.float32)
    w2 = glorot(k2, hidden_channels, hidden_channels)
    b2 = 0.1 * jax.random.normal(kb2, (hidden_channels,), jnp.float32)
    w3 = glorot(k3, hidden_channels, out_channels)
    b3 = 0.1 * jax.random.normal(kb3, (out_channels,), jnp.float32)
    return (w1, b1, w2, b2, w3, b3)


class GCNGNNClassifierPallas:
    def __init__(self, key, in_channels=4, hidden_channels=16, out_channels=1):
        assert max(in_channels, hidden_channels, out_channels) < BIAS_ROW
        self.params = init_params(key, in_channels, hidden_channels, out_channels)
        self._fwd = jax.jit(
            lambda x, ei, params: gcn_forward_pallas(x, ei, params))

    def __call__(self, x, edge_index):
        return self._fwd(x, edge_index, self.params)


def gcn_forward_ref(a_hat, x, params):
    w1, b1, w2, b2, w3, b3 = params
    h = jnp.maximum(a_hat @ (x @ w1) + b1[None, :], 0.0)
    h = jnp.maximum(a_hat @ (h @ w2) + b2[None, :], 0.0)
    return jax.nn.sigmoid(a_hat @ (h @ w3) + b3[None, :])


if __name__ == "__main__":
    key = jax.random.PRNGKey(0)
    k_feat, k_edge, k_param = jax.random.split(key, 3)

    num_nodes, num_edges = 200, 800
    in_channels, hidden_channels, out_channels = 4, 16, 1

    x = jax.random.normal(k_feat, (num_nodes, in_channels), dtype=jnp.float32)
    edge_index = jax.random.randint(k_edge, (2, num_edges), 0, num_nodes,
                                    dtype=jnp.int32)

    model = GCNGNNClassifierPallas(k_param, in_channels, hidden_channels,
                                   out_channels)
    out = jax.block_until_ready(model(x, edge_index))
    assert out.shape == (num_nodes, out_channels)

    # Pure-f32 JAX reference (bf16 A / activations in the kernel -> ~2e-2 abs
    # tolerance on the sigmoid outputs).
    a_hat = normalized_adjacency(edge_index, num_nodes)
    ref = gcn_forward_ref(a_hat, x, model.params)
    max_diff = float(jnp.max(jnp.abs(out - ref)))
    assert max_diff < 2e-2, f"fused-path mismatch vs reference: {max_diff}"

    # Also exercise the tiled / streamed fallback (used when A_hat does not fit
    # VMEM).  tile=128 here only so the toy graph yields a real (2, 2) grid and
    # the accumulator init/finalize path gets tested; production default is 512.
    tiled_fwd = jax.jit(
        lambda xx, ei, p: gcn_forward_pallas(xx, ei, p, tile=128,
                                             force_tiled=True))
    out_tiled = jax.block_until_ready(tiled_fwd(x, edge_index, model.params))
    max_diff_t = float(jnp.max(jnp.abs(out_tiled - ref)))
    assert max_diff_t < 2e-2, f"tiled-path mismatch vs reference: {max_diff_t}"

    print("KERNEL_OK")
</pallas_src>

<mosaic_0001>
module attributes {stable_mosaic.version = 11 : i64} {
  func.func @_gcn_fused_kernel(%arg0: memref<32x256xbf16, #tpu.memory_space<vmem>>, %arg1: memref<256x256xbf16, #tpu.memory_space<vmem>>, %arg2: memref<32x32xbf16, #tpu.memory_space<vmem>>, %arg3: memref<32x32xbf16, #tpu.memory_space<vmem>>, %arg4: memref<32x32xbf16, #tpu.memory_space<vmem>>, %arg5: memref<32x256xf32, #tpu.memory_space<vmem>>) attributes {dimension_semantics = [], scalar_prefetch = 0 : i64, scratch_operands = 0 : i64, tpu.core_type = #tpu.core_type<tc>} {
    %c0 = arith.constant 0 : index
    %c0_0 = arith.constant 0 : index
    %0 = vector.load %arg1[%c0, %c0_0] : memref<256x256xbf16, #tpu.memory_space<vmem>>, vector<256x256xbf16>
    %c0_1 = arith.constant 0 : index
    %c0_2 = arith.constant 0 : index
    %1 = vector.load %arg0[%c0_1, %c0_2] : memref<32x256xbf16, #tpu.memory_space<vmem>>, vector<32x256xbf16>
    %cst = arith.constant dense<0.000000e+00> : vector<32x256xf32>
    %2 = tpu.matmul %1, %0, %cst {dimension_numbers = #tpu.dot_dimension_numbers<[1], [0], [0], [1], [0, 0, 1, 1], [], []>} : vector<32x256xbf16>, vector<256x256xbf16>, vector<32x256xf32> -> vector<32x256xf32>
    %3 = tpu.iota {dimensions = array<i32: 0>} : vector<32x256xi32>
    %c31_i32 = arith.constant 31 : i32
    %4 = vector.broadcast %c31_i32 : i32 to vector<32x256xi32>
    %5 = arith.cmpi eq, %3, %4 : vector<32x256xi32>
    %cst_3 = arith.constant 1.000000e+00 : f32
    %6 = vector.broadcast %cst_3 : f32 to vector<32x256xf32>
    %7 = arith.select %5, %6, %2 : vector<32x256xi1>, vector<32x256xf32>
    %8 = arith.truncf %7 : vector<32x256xf32> to vector<32x256xbf16>
    %c0_4 = arith.constant 0 : index
    %c0_5 = arith.constant 0 : index
    %9 = vector.load %arg2[%c0_4, %c0_5] : memref<32x32xbf16, #tpu.memory_space<vmem>>, vector<32x32xbf16>
    %cst_6 = arith.constant dense<0.000000e+00> : vector<32x256xf32>
    %10 = tpu.matmul %9, %8, %cst_6 {dimension_numbers = #tpu.dot_dimension_numbers<[1], [0], [0], [1], [0, 0, 1, 1], [], []>} : vector<32x32xbf16>, vector<32x256xbf16>, vector<32x256xf32> -> vector<32x256xf32>
    %cst_7 = arith.constant 0.000000e+00 : f32
    %11 = vector.broadcast %cst_7 : f32 to vector<32x256xf32>
    %12 = arith.maximumf %10, %11 : vector<32x256xf32>
    %13 = arith.truncf %12 : vector<32x256xf32> to vector<32x256xbf16>
    %cst_8 = arith.constant dense<0.000000e+00> : vector<32x256xf32>
    %14 = tpu.matmul %13, %0, %cst_8 {dimension_numbers = #tpu.dot_dimension_numbers<[1], [0], [0], [1], [0, 0, 1, 1], [], []>} : vector<32x256xbf16>, vector<256x256xbf16>, vector<32x256xf32> -> vector<32x256xf32>
    %15 = tpu.iota {dimensions = array<i32: 0>} : vector<32x256xi32>
    %c31_i32_9 = arith.constant 31 : i32
    %16 = vector.broadcast %c31_i32_9 : i32 to vector<32x256xi32>
    %17 = arith.cmpi eq, %15, %16 : vector<32x256xi32>
    %cst_10 = arith.constant 1.000000e+00 : f32
    %18 = vector.broadcast %cst_10 : f32 to vector<32x256xf32>
    %19 = arith.select %17, %18, %14 : vector<32x256xi1>, vector<32x256xf32>
    %20 = arith.truncf %19 : vector<32x256xf32> to vector<32x256xbf16>
    %c0_11 = arith.constant 0 : index
    %c0_12 = arith.constant 0 : index
    %21 = vector.load %arg3[%c0_11, %c0_12] : memref<32x32xbf16, #tpu.memory_space<vmem>>, vector<32x32xbf16>
    %cst_13 = arith.constant dense<0.000000e+00> : vector<32x256xf32>
    %22 = tpu.matmul %21, %20, %cst_13 {dimension_numbers = #tpu.dot_dimension_numbers<[1], [0], [0], [1], [0, 0, 1, 1], [], []>} : vector<32x32xbf16>, vector<32x256xbf16>, vector<32x256xf32> -> vector<32x256xf32>
    %cst_14 = arith.constant 0.000000e+00 : f32
    %23 = vector.broadcast %cst_14 : f32 to vector<32x256xf32>
    %24 = arith.maximumf %22, %23 : vector<32x256xf32>
    %25 = arith.truncf %24 : vector<32x256xf32> to vector<32x256xbf16>
    %cst_15 = arith.constant dense<0.000000e+00> : vector<32x256xf32>
    %26 = tpu.matmul %25, %0, %cst_15 {dimension_numbers = #tpu.dot_dimension_numbers<[1], [0], [0], [1], [0, 0, 1, 1], [], []>} : vector<32x256xbf16>, vector<256x256xbf16>, vector<32x256xf32> -> vector<32x256xf32>
    %27 = tpu.iota {dimensions = array<i32: 0>} : vector<32x256xi32>
    %c31_i32_16 = arith.constant 31 : i32
    %28 = vector.broadcast %c31_i32_16 : i32 to vector<32x256xi32>
    %29 = arith.cmpi eq, %27, %28 : vector<32x256xi32>
    %cst_17 = arith.constant 1.000000e+00 : f32
    %30 = vector.broadcast %cst_17 : f32 to vector<32x256xf32>
    %31 = arith.select %29, %30, %26 : vector<32x256xi1>, vector<32x256xf32>
    %32 = arith.truncf %31 : vector<32x256xf32> to vector<32x256xbf16>
    %c0_18 = arith.constant 0 : index
    %c0_19 = arith.constant 0 : index
    %33 = vector.load %arg4[%c0_18, %c0_19] : memref<32x32xbf16, #tpu.memory_space<vmem>>, vector<32x32xbf16>
    %cst_20 = arith.constant dense<0.000000e+00> : vector<32x256xf32>
    %34 = tpu.matmul %33, %32, %cst_20 {dimension_numbers = #tpu.dot_dimension_numbers<[1], [0], [0], [1], [0, 0, 1, 1], [], []>} : vector<32x32xbf16>, vector<32x256xbf16>, vector<32x256xf32> -> vector<32x256xf32>
    %35 = arith.negf %34 : vector<32x256xf32>
    %36 = math.exp %35 : vector<32x256xf32>
    %cst_21 = arith.constant 1.000000e+00 : f32
    %37 = vector.broadcast %cst_21 : f32 to vector<32x256xf32>
    %38 = arith.addf %37, %36 : vector<32x256xf32>
    %39 = arith.divf %37, %38 : vector<32x256xf32>
    %c0_22 = arith.constant 0 : index
    %c0_23 = arith.constant 0 : index
    %40 = vector.load %arg5[%c0_22, %c0_23] : memref<32x256xf32, #tpu.memory_space<vmem>>, vector<32x256xf32>
    tpu.vector_store %arg5[%c0_22, %c0_23], %39 {strides = array<i32>} : memref<32x256xf32, #tpu.memory_space<vmem>>, vector<32x256xf32>,
    return
  }
}

</mosaic_0001>

<bundles_post_ra>
// kernel: _lambda_.1
= control target key start
LH: loop header
LB: loop body
LE: loop exit
PB: predicated region body
PF: predicated region fallthrough
CT: control target
= control target key end

     0   :  { %vm348_vm1 = vcmask 261120   ;;  %s1685_s1 = inlined_call_operand.vmem [shape: bf16[256,256], index: 1, kind: input, shape index: {}]   ;;  %s1686_s0 = inlined_call_operand.vmem [shape: bf16[32,256], index: 0, kind: input, shape index: {}]   ;;  %s1687_s2 = inlined_call_operand.vmem [shape: bf16[32,32], index: 2, kind: input, shape index: {}]   ;;  %s1688_s3 = inlined_call_operand.vmem [shape: bf16[32,32], index: 3, kind: input, shape index: {}]   ;;  %s1689_s4 = inlined_call_operand.vmem [shape: bf16[32,32], index: 4, kind: input, shape index: {}]   ;;  %s1690_s5 = inlined_call_operand.vmem [shape: f32[32,256], index: 5, kind: output, shape index: {}]  }
   0x1   :  { %v947_v0 = vld [vmem:[%s1685_s1 + $0x70] sm:$0xf]  ;;  %v1076_v1 = vld [vmem:[%s1685_s1 + $0x74] sm:$0xf0]  ;;  %v1075_v5 = vld [vmem:[%s1685_s1 + $0x74] sm:$0xf] }
   0x2   :  { %v1011_v2 = vld [vmem:[%s1685_s1 + $0xf0] sm:$0xf]  ;;  %v1178_v3 = vor.u32 %v1076_v1, %v947_v0  ;;  %v1092_v4 = vld [vmem:[%s1685_s1 + $0xf4] sm:$0xf0]  ;;  %v949_v6 = vld [vmem:[%s1685_s1 + $0x78] sm:$0xf0] }
   0x3   :  { %v1189_v7 = vor.u32 %v1092_v4, %v1011_v2  ;;  %v1191_v8 = vor.u32 %v1075_v5, %v949_v6  ;;  %v1091_v9 = vld [vmem:[%s1685_s1 + $0xf4] sm:$0xf]  ;;  %v1013_v10 = vld [vmem:[%s1685_s1 + $0xf8] sm:$0xf0]  ;;  %v939_v11 = vld [vmem:[%s1685_s1 + $0x60] sm:$0xf] }
   0x4   :  { %237 = vmatpush.bf16.msra.mxu0 %v1178_v3  ;;  %v1203_v12 = vor.u32 %v1091_v9, %v1013_v10  ;;  %v1074_v13 = vld [vmem:[%s1685_s1 + $0x64] sm:$0xf0]  ;;  %v1003_v14 = vld [vmem:[%s1685_s1 + $0xe0] sm:$0xf]  ;;  %v1073_v18 = vld [vmem:[%s1685_s1 + $0x64] sm:$0xf] }
   0x5   :  { %v1090_v15 = vld [vmem:[%s1685_s1 + $0xe4] sm:$0xf0]  ;;  %256 = vmatpush.bf16.msra.mxu1 %v1189_v7  ;;  %275 = vmatpush.bf16.msra.mxu2 %v1191_v8  ;;  %v1216_v16 = vor.u32 %v1074_v13, %v939_v11  ;;  %v941_v19 = vld [vmem:[%s1685_s1 + $0x68] sm:$0xf0]  ;;  %v1089_v20 = vld [vmem:[%s1685_s1 + $0xe4] sm:$0xf] }
   0x6   :  { %v1218_v17 = vor.u32 %v1090_v15, %v1003_v14  ;;  %294 = vmatpush.bf16.msra.mxu3 %v1203_v12  ;;  %v1230_v21 = vor.u32 %v1073_v18, %v941_v19  ;;  %v1005_v22 = vld [vmem:[%s1685_s1 + $0xe8] sm:$0xf0]  ;;  %v931_v23 = vld [vmem:[%s1685_s1 + $0x50] sm:$0xf]  ;;  %v1072_v24 = vld [vmem:[%s1685_s1 + $0x54] sm:$0xf0] }
   0x7   :  { %v1241_v25 = vor.u32 %v1089_v20, %v1005_v22  ;;  %v995_v26 = vld [vmem:[%s1685_s1 + $0xd0] sm:$0xf]  ;;  %v1088_v27 = vld [vmem:[%s1685_s1 + $0xd4] sm:$0xf0]  ;;  %v1071_v28 = vld [vmem:[%s1685_s1 + $0x54] sm:$0xf]  ;;  %v1253_v29 = vor.u32 %v1072_v24, %v931_v23 }
   0x8   :  { %238 = vmatpush.bf16.msra.mxu0 %v1216_v16  ;;  %v933_v30 = vld [vmem:[%s1685_s1 + $0x58] sm:$0xf0]  ;;  %v1087_v31 = vld [vmem:[%s1685_s1 + $0xd4] sm:$0xf]  ;;  %v1266_v33 = vor.u32 %v1088_v27, %v995_v26  ;;  %v923_v35 = vld [vmem:[%s1685_s1 + $0x40] sm:$0xf] }
   0x9   :  { %v997_v32 = vld [vmem:[%s1685_s1 + $0xd8] sm:$0xf0]  ;;  %257 = vmatpush.bf16.msra.mxu1 %v1218_v17  ;;  %276 = vmatpush.bf16.msra.mxu2 %v1230_v21  ;;  %v1268_v34 = vor.u32 %v1071_v28, %v933_v30  ;;  %v1070_v36 = vld [vmem:[%s1685_s1 + $0x44] sm:$0xf0]  ;;  %v987_v37 = vld [vmem:[%s1685_s1 + $0xc0] sm:$0xf] }
   0xa   :  { %295 = vmatpush.bf16.msra.mxu3 %v1241_v25  ;;  %v1280_v38 = vor.u32 %v1087_v31, %v997_v32  ;;  %v1086_v39 = vld [vmem:[%s1685_s1 + $0xc4] sm:$0xf0]  ;;  %v1069_v40 = vld [vmem:[%s1685_s1 + $0x44] sm:$0xf]  ;;  %v925_v41 = vld [vmem:[%s1685_s1 + $0x48] sm:$0xf0]  ;;  %v1298_v44 = vor.u32 %v1070_v36, %v923_v35 }
   0xb   :  { %v1085_v42 = vld [vmem:[%s1685_s1 + $0xc4] sm:$0xf]  ;;  %v989_v43 = vld [vmem:[%s1685_s1 + $0xc8] sm:$0xf0]  ;;  %v1302_v45 = vor.u32 %v1086_v39, %v987_v37  ;;  %v1304_v46 = vor.u32 %v1069_v40, %v925_v41  ;;  %v915_v47 = vld [vmem:[%s1685_s1 + $0x30] sm:$0xf] }
   0xc   :  { %239 = vmatpush.bf16.msra.mxu0 %v1253_v29  ;;  %v1068_v48 = vld [vmem:[%s1685_s1 + $0x34] sm:$0xf0]  ;;  %v979_v49 = vld [vmem:[%s1685_s1 + $0xb0] sm:$0xf]  ;;  %v1316_v50 = vor.u32 %v1085_v42, %v989_v43  ;;  %v1067_v52 = vld [vmem:[%s1685_s1 + $0x34] sm:$0xf] }
   0xd   :  { %258 = vmatpush.bf16.msra.mxu1 %v1266_v33  ;;  %277 = vmatpush.bf16.msra.mxu2 %v1268_v34  ;;  %v1084_v51 = vld [vmem:[%s1685_s1 + $0xb4] sm:$0xf0]  ;;  %v917_v53 = vld [vmem:[%s1685_s1 + $0x38] sm:$0xf0]  ;;  %v1083_v54 = vld [vmem:[%s1685_s1 + $0xb4] sm:$0xf]  ;;  %v1334_v56 = vor.u32 %v1068_v48, %v915_v47 }
   0xe   :  { %296 = vmatpush.bf16.msra.mxu3 %v1280_v38  ;;  %v981_v55 = vld [vmem:[%s1685_s1 + $0xb8] sm:$0xf0]  ;;  %v1338_v57 = vor.u32 %v1084_v51, %v979_v49  ;;  %v1340_v58 = vor.u32 %v1067_v52, %v917_v53  ;;  %v907_v59 = vld [vmem:[%s1685_s1 + $0x20] sm:$0xf]  ;;  %v1066_v60 = vld [vmem:[%s1685_s1 + $0x24] sm:$0xf0] }
   0xf   :  { %v971_v61 = vld [vmem:[%s1685_s1 + $0xa0] sm:$0xf]  ;;  %v1352_v62 = vor.u32 %v1083_v54, %v981_v55  ;;  %v1082_v63 = vld [vmem:[%s1685_s1 + $0xa4] sm:$0xf0]  ;;  %v1065_v0 = vld [vmem:[%s1685_s1 + $0x24] sm:$0xf]  ;;  %v1370_v5 = vor.u32 %v1066_v60, %v907_v59 }
  0x10   :  { %240 = vmatpush.bf16.msra.mxu0 %v1298_v44  ;;  %v909_v1 = vld [vmem:[%s1685_s1 + $0x28] sm:$0xf0]  ;;  %v1081_v2 = vld [vmem:[%s1685_s1 + $0xa4] sm:$0xf]  ;;  %v1374_v6 = vor.u32 %v1082_v63, %v971_v61  ;;  %v899_v10 = vld [vmem:[%s1685_s1 + $0x10] sm:$0xf] }
  0x11   :  { %259 = vmatpush.bf16.msra.mxu1 %v1302_v45  ;;  %278 = vmatpush.bf16.msra.mxu2 %v1304_v46  ;;  %v973_v4 = vld [vmem:[%s1685_s1 + $0xa8] sm:$0xf0]  ;;  %v1376_v9 = vor.u32 %v1065_v0, %v909_v1  ;;  %v1064_v11 = vld [vmem:[%s1685_s1 + $0x14] sm:$0xf0]  ;;  %v963_v13 = vld [vmem:[%s1685_s1 + $0x90] sm:$0xf] }
  0x12   :  { %297 = vmatpush.bf16.msra.mxu3 %v1316_v50  ;;  %v1388_v14 = vor.u32 %v1081_v2, %v973_v4  ;;  %v1080_v15 = vld [vmem:[%s1685_s1 + $0x94] sm:$0xf0]  ;;  %v1063_v18 = vld [vmem:[%s1685_s1 + $0x14] sm:$0xf]  ;;  %v901_v19 = vld [vmem:[%s1685_s1 + $0x18] sm:$0xf0]  ;;  %v1406_v23 = vor.u32 %v1064_v11, %v899_v10 }
  0x13   :  { %v1079_v20 = vld [vmem:[%s1685_s1 + $0x94] sm:$0xf]  ;;  %v965_v22 = vld [vmem:[%s1685_s1 + $0x98] sm:$0xf0]  ;;  %v1410_v24 = vor.u32 %v1080_v15, %v963_v13  ;;  %v1412_v26 = vor.u32 %v1063_v18, %v901_v19  ;;  %v891_v27 = vld [vmem:[%s1685_s1] sm:$0xf]  ;;  %v313_v13 = vlaneseq }
  0x14   :  { %241 = vmatpush.bf16.msra.mxu0 %v1334_v56  ;;  %v1062_v28 = vld [vmem:[%s1685_s1 + $0x4] sm:$0xf0]  ;;  %v955_v30 = vld [vmem:[%s1685_s1 + $0x80] sm:$0xf]  ;;  %v1424_v31 = vor.u32 %v1079_v20, %v965_v22  ;;  %v1061_v35 = vld [vmem:[%s1685_s1 + $0x4] sm:$0xf] }
  0x15   :  { %260 = vmatpush.bf16.msra.mxu1 %v1338_v57  ;;  %279 = vmatpush.bf16.msra.mxu2 %v1340_v58  ;;  %v1078_v32 = vld [vmem:[%s1685_s1 + $0x84] sm:$0xf0]  ;;  %v893_v36 = vld [vmem:[%s1685_s1 + $0x8] sm:$0xf0]  ;;  %v1077_v37 = vld [vmem:[%s1685_s1 + $0x84] sm:$0xf]  ;;  %v1442_v40 = vor.u32 %v1062_v28, %v891_v27 }
  0x16   :  { %298 = vmatpush.bf16.msra.mxu3 %v1352_v62  ;;  %v957_v39 = vld [vmem:[%s1685_s1 + $0x88] sm:$0xf0]  ;;  %v875_v41 = vld [vmem:[%s1686_s0] sm:$0xf]  ;;  %v1094_v42 = vld [vmem:[%s1686_s0 + $0x4] sm:$0xf0]  ;;  %v1452_v43 = vor.u32 %v1078_v32, %v955_v30  ;;  %v1454_v47 = vor.u32 %v1061_v35, %v893_v36 }
  0x17   :  { %v1093_v48 = vld [vmem:[%s1686_s0 + $0x4] sm:$0xf]  ;;  %v877_v49 = vld [vmem:[%s1686_s0 + $0x8] sm:$0xf0]  ;;  %v1463_v51 = vor.u32 %v1077_v37, %v957_v39  ;;  %v876_v52 = vor.u32 %v1094_v42, %v875_v41  ;;  %v883_v54 = vld [vmem:[%s1686_s0 + $0x10] sm:$0xf] }
  0x18   :  { %242 = vmatpush.bf16.msra.mxu0 %v1370_v5  ;;  %v880_v53 = vor.u32 %v1093_v48, %v877_v49  ;;  %v1096_v55 = vld [vmem:[%s1686_s0 + $0x14] sm:$0xf0]  ;;  %v1095_v59 = vld [vmem:[%s1686_s0 + $0x14] sm:$0xf]  ;;  %v885_v60 = vld [vmem:[%s1686_s0 + $0x18] sm:$0xf0] }
  0x19   :  { %261 = vmatpush.bf16.msra.mxu1 %v1374_v6  ;;  %280 = vmatpush.bf16.msra.mxu2 %v1376_v9  ;;  %v884_v61 = vor.u32 %v1096_v55, %v883_v54  ;;  %v888_v63 = vor.u32 %v1095_v59, %v885_v60  ;;  %v314_v22 = vshrl.u32 %v313_v13, 7  ;;  %v1097_v59 = vld [vmem:[%s1687_s2] sm:$0xff] }
  0x1a   :  { %299 = vmatpush.bf16.msra.mxu3 %v1388_v14 }
  0x1b   :  { %v1497_v27 = vadd.s32 24, %v314_v22 }
  0x1c   :  { %243 = vmatpush.bf16.msra.mxu0 %v1406_v23 }
  0x1d   :  { %262 = vmatpush.bf16.msra.mxu1 %v1410_v24  ;;  %281 = vmatpush.bf16.msra.mxu2 %v1412_v26  ;;  %vm321_vm0 = vcmp.eq.s32.totalorder %v1497_v27, 31 }
  0x1e   :  { %300 = vmatpush.bf16.msra.mxu3 %v1424_v31 }
  0x20   :  { %244 = vmatpush.bf16.msra.mxu0 %v1442_v40 }
  0x21   :  { %263 = vmatpush.bf16.msra.mxu1 %v1452_v43  ;;  %282 = vmatpush.bf16.msra.mxu2 %v1454_v47 }
  0x22   :  { %301 = vmatpush.bf16.msra.mxu3 %v1463_v51 }
  0x23   :  { %245 = vmatmul.bf16.vlgmr.msra.gmra.mxu0 %v876_v52 }
  0x24   :  { %264 = vmatmul.bf16.vlgmr.msra.gmra.mxu1 %v880_v53  ;;  %283 = vmatmul.bf16.vlgmr.msra.gmra.mxu2 %v876_v52 }
  0x25   :  { %405 = vmatpush.bf16.msrb.mxu2 %v1178_v3  ;;  %302 = vmatmul.bf16.vlgmr.msra.gmra.mxu3 %v880_v53 }
  0x26   :  { %424 = vmatpush.bf16.msrb.mxu3 %v1189_v7 }
  0x29   :  { %406 = vmatpush.bf16.msrb.mxu2 %v1216_v16 }
  0x2a   :  { %425 = vmatpush.bf16.msrb.mxu3 %v1218_v17 }
  0x2d   :  { %407 = vmatpush.bf16.msrb.mxu2 %v1253_v29 }
  0x2e   :  { %426 = vmatpush.bf16.msrb.mxu3 %v1266_v33 }
  0x31   :  { %408 = vmatpush.bf16.msrb.mxu2 %v1298_v44 }
  0x32   :  { %427 = vmatpush.bf16.msrb.mxu3 %v1302_v45 }
  0x33   :  { %250 = vmatmul.bf16.gmra.mxu0 %v884_v61 }
  0x34   :  { %269 = vmatmul.bf16.gmra.mxu1 %v888_v63  ;;  %288 = vmatmul.bf16.gmra.mxu2 %v884_v61 }
  0x35   :  { %409 = vmatpush.bf16.msrb.mxu2 %v1334_v56  ;;  %307 = vmatmul.bf16.gmra.mxu3 %v888_v63 }
  0x36   :  { %428 = vmatpush.bf16.msrb.mxu3 %v1338_v57 }
  0x39   :  { %410 = vmatpush.bf16.msrb.mxu2 %v1370_v5 }
  0x3a   :  { %429 = vmatpush.bf16.msrb.mxu3 %v1374_v6 }
  0x3d   :  { %411 = vmatpush.bf16.msrb.mxu2 %v1406_v23 }
  0x3e   :  { %430 = vmatpush.bf16.msrb.mxu3 %v1410_v24 }
  0x41   :  { %412 = vmatpush.bf16.msrb.mxu2 %v1442_v40 }
  0x42   :  { %431 = vmatpush.bf16.msrb.mxu3 %v1452_v43 }
  0xa0   :  { %v246_v0 = vpop.f32.mrf.mxu0 }
  0xa1   :  { %v265_v1 = vpop.f32.mrf.mxu1 }
  0xa2   :  { %v266_v48 = vadd.f32 %v265_v1, %v246_v0 }
  0xa7   :  { %v284_v2 = vpop.f32.mrf.mxu2 }
  0xa8   :  { %v303_v4 = vpop.f32.mrf.mxu3  ;;  %v248_v10 = vpop.f32.mrf.mxu0 }
  0xa9   :  { %v267_v11 = vpop.f32.mrf.mxu1  ;;  %v304_v0 = vadd.f32 %v303_v4, %v284_v2  ;;  %v1098_v2 = vld [vmem:[%s1687_s2 + $0x8] sm:$0xff] }
  0xaa   :  { %v268_v41 = vadd.f32 %v267_v11, %v248_v10 }
  0xac   :  { %v330_v54 = vpack.c.bf16 %v268_v41, %v266_v48 }
  0xaf   :  { %v286_v15 = vpop.f32.mrf.mxu2 }
  0xb0   :  { %v305_v18 = vpop.f32.mrf.mxu3  ;;  %v251_v19 = vpop.f32.mrf.mxu0 }
  0xb1   :  { %v270_v20 = vpop.f32.mrf.mxu1  ;;  %v306_v61 = vadd.f32 %v305_v18, %v286_v15 }
  0xb2   :  { %v271_v37 = vadd.f32 %v270_v20, %v251_v19 }
  0xb3   :  { %v331_v1 = vpack.c.bf16 %v306_v61, %v304_v0 }
  0xb7   :  { %v289_v28 = vpop.f32.mrf.mxu2 }
  0xb8   :  { %v308_v30 = vpop.f32.mrf.mxu3  ;;  %v253_v32 = vpop.f32.mrf.mxu0 }
  0xb9   :  { %v272_v35 = vpop.f32.mrf.mxu1  ;;  %v309_v55 = vadd.f32 %v308_v30, %v289_v28 }
  0xba   :  { %v273_v36 = vadd.f32 %v272_v35, %v253_v32 }
  0xbc   :  { %v328_v39 = vsel %vm321_vm0, 1.0, %v273_v36 }
  0xbd   :  { %v332_v42 = vpack.c.bf16 %v328_v39, %v271_v37 }
  0xbf   :  { %v291_v49 = vpop.f32.mrf.mxu2  ;;  %361 = vmatpush.bf16.msrb.mxu0 %v332_v42 }
  0xc0   :  { %v310_v52 = vpop.f32.mrf.mxu3 }
  0xc1   :  { %v311_v53 = vadd.f32 %v310_v52, %v291_v49 }
  0xc3   :  { %362 = vmatpush.bf16.msrb.mxu0 %v330_v54  ;;  %v329_v60 = vsel %vm321_vm0, 1.0, %v311_v53 }
  0xc4   :  { %v333_v63 = vpack.c.bf16 %v329_v60, %v309_v55 }
  0xc6   :  { %380 = vmatpush.bf16.msrb.mxu1 %v333_v63  ;;  %1025 = vmatmul.msk.bf16.vlgmr.msrb.gmra.mxu0 %vm348_vm1, %v1097_v59 }
  0xc7   :  { %443 = vmatpush.bf16.msra.mxu0 %v1191_v8 }
  0xca   :  { %381 = vmatpush.bf16.msrb.mxu1 %v331_v1 }
  0xcb   :  { %444 = vmatpush.bf16.msra.mxu0 %v1230_v21 }
  0xcd   :  { %1027 = vmatmul.msk.bf16.vlgmr.msrb.gmra.mxu1 %vm348_vm1, %v1097_v59 }
  0xce   :  { %462 = vmatpush.bf16.msra.mxu1 %v1203_v12 }
  0xcf   :  { %445 = vmatpush.bf16.msra.mxu0 %v1268_v34 }
  0xd2   :  { %463 = vmatpush.bf16.msra.mxu1 %v1241_v25 }
  0xd3   :  { %446 = vmatpush.bf16.msra.mxu0 %v1304_v46 }
  0xd6   :  { %464 = vmatpush.bf16.msra.mxu1 %v1280_v38  ;;  %1026 = vmatmul.msk.bf16.gmra.mxu0 %vm348_vm1, %v1098_v2 }
  0xd7   :  { %447 = vmatpush.bf16.msra.mxu0 %v1340_v58 }
  0xda   :  { %465 = vmatpush.bf16.msra.mxu1 %v1316_v50 }
  0xdb   :  { %448 = vmatpush.bf16.msra.mxu0 %v1376_v9 }
  0xdd   :  { %1028 = vmatmul.msk.bf16.gmra.mxu1 %vm348_vm1, %v1098_v2  ;;  %v1099_v2 = vld [vmem:[%s1688_s3] sm:$0xff] }
  0xde   :  { %466 = vmatpush.bf16.msra.mxu1 %v1352_v62 }
  0xdf   :  { %449 = vmatpush.bf16.msra.mxu0 %v1412_v26 }
  0xe2   :  { %467 = vmatpush.bf16.msra.mxu1 %v1388_v14 }
  0xe3   :  { %450 = vmatpush.bf16.msra.mxu0 %v1454_v47 }
  0xe6   :  { %468 = vmatpush.bf16.msra.mxu1 %v1424_v31 }
  0xe7   :  { %563 = vmatpush.bf16.msrb.mxu0 %v1178_v3 }
  0xea   :  { %469 = vmatpush.bf16.msra.mxu1 %v1463_v51 }
  0xeb   :  { %564 = vmatpush.bf16.msrb.mxu0 %v1216_v16 }
  0xee   :  { %582 = vmatpush.bf16.msrb.mxu1 %v1189_v7 }
  0xef   :  { %565 = vmatpush.bf16.msrb.mxu0 %v1253_v29 }
  0xf2   :  { %583 = vmatpush.bf16.msrb.mxu1 %v1218_v17 }
  0xf3   :  { %566 = vmatpush.bf16.msrb.mxu0 %v1298_v44 }
  0xf6   :  { %584 = vmatpush.bf16.msrb.mxu1 %v1266_v33 }
  0xf7   :  { %567 = vmatpush.bf16.msrb.mxu0 %v1334_v56 }
  0xfa   :  { %585 = vmatpush.bf16.msrb.mxu1 %v1302_v45 }
  0xfb   :  { %568 = vmatpush.bf16.msrb.mxu0 %v1370_v5 }
  0xfe   :  { %586 = vmatpush.bf16.msrb.mxu1 %v1338_v57 }
  0xff   :  { %569 = vmatpush.bf16.msrb.mxu0 %v1406_v23 }
 0x102   :  { %587 = vmatpush.bf16.msrb.mxu1 %v1374_v6 }
 0x103   :  { %570 = vmatpush.bf16.msrb.mxu0 %v1442_v40 }
 0x106   :  { %588 = vmatpush.bf16.msrb.mxu1 %v1410_v24 }
 0x10a   :  { %589 = vmatpush.bf16.msrb.mxu1 %v1452_v43 }
 0x143   :  { %v364_v3 = vpop.f32.mrf.mxu0 }
 0x144   :  { %v393_v17 = vmax.f32 %v364_v3, 0.0 }
 0x14a   :  { %v383_v7 = vpop.f32.mrf.mxu1 }
 0x14b   :  { %v366_v16 = vpop.f32.mrf.mxu0  ;;  %v394_v45 = vmax.f32 %v383_v7, 0.0 }
 0x14c   :  { %v395_v29 = vmax.f32 %v366_v16, 0.0 }
 0x14e   :  { %v401_v33 = vpack.c.bf16 %v395_v29, %v393_v17 }
 0x150   :  { %413 = vmatmul.bf16.vlgmr.msrb.gmra.mxu2 %v401_v33  ;;  %451 = vmatmul.bf16.vlgmr.msra.gmra.mxu0 %v401_v33 }
 0x152   :  { %v385_v44 = vpop.f32.mrf.mxu1 }
 0x153   :  { %v396_v56 = vmax.f32 %v385_v44, 0.0  ;;  %v369_v57 = vpop.f32.mrf.mxu0 }
 0x154   :  { %v397_v24 = vmax.f32 %v369_v57, 0.0 }
 0x155   :  { %v402_v5 = vpack.c.bf16 %v396_v56, %v394_v45 }
 0x157   :  { %432 = vmatmul.bf16.vlgmr.msrb.gmra.mxu3 %v402_v5  ;;  %470 = vmatmul.bf16.vlgmr.msra.gmra.mxu1 %v402_v5 }
 0x15a   :  { %v388_v6 = vpop.f32.mrf.mxu1 }
 0x15b   :  { %v371_v23 = vpop.f32.mrf.mxu0  ;;  %v398_v10 = vmax.f32 %v388_v6, 0.0 }
 0x15c   :  { %v399_v40 = vmax.f32 %v371_v23, 0.0 }
 0x15e   :  { %v403_v43 = vpack.c.bf16 %v399_v40, %v397_v24 }
 0x160   :  { %418 = vmatmul.bf16.gmra.mxu2 %v403_v43  ;;  %456 = vmatmul.bf16.gmra.mxu0 %v403_v43 }
 0x162   :  { %v390_v4 = vpop.f32.mrf.mxu1 }
 0x163   :  { %v400_v11 = vmax.f32 %v390_v4, 0.0 }
 0x165   :  { %v404_v13 = vpack.c.bf16 %v400_v11, %v398_v10 }
 0x167   :  { %437 = vmatmul.bf16.gmra.mxu3 %v404_v13  ;;  %475 = vmatmul.bf16.gmra.mxu1 %v404_v13 }
 0x1cd   :  { %v452_v15 = vpop.f32.mrf.mxu0 }
 0x1d3   :  { %v414_v18 = vpop.f32.mrf.mxu2 }
 0x1d4   :  { %v471_v19 = vpop.f32.mrf.mxu1 }
 0x1d5   :  { %v454_v20 = vpop.f32.mrf.mxu0  ;;  %v472_v55 = vadd.f32 %v471_v19, %v452_v15 }
 0x1da   :  { %v433_v22 = vpop.f32.mrf.mxu3 }
 0x1db   :  { %v416_v30 = vpop.f32.mrf.mxu2  ;;  %v434_v16 = vadd.f32 %v433_v22, %v414_v18 }
 0x1dc   :  { %v473_v28 = vpop.f32.mrf.mxu1 }
 0x1dd   :  { %v457_v32 = vpop.f32.mrf.mxu0  ;;  %v474_v53 = vadd.f32 %v473_v28, %v454_v20 }
 0x1df   :  { %v490_v63 = vpack.c.bf16 %v474_v53, %v472_v55 }
 0x1e2   :  { %v435_v35 = vpop.f32.mrf.mxu3 }
 0x1e3   :  { %v419_v37 = vpop.f32.mrf.mxu2  ;;  %v436_v3 = vadd.f32 %v435_v35, %v416_v30 }
 0x1e4   :  { %v476_v36 = vpop.f32.mrf.mxu1 }
 0x1e5   :  { %v459_v41 = vpop.f32.mrf.mxu0  ;;  %v477_v49 = vadd.f32 %v476_v36, %v457_v32  ;;  %v489_v17 = vpack.c.bf16 %v436_v3, %v434_v16 }
 0x1ea   :  { %v438_v39 = vpop.f32.mrf.mxu3 }
 0x1eb   :  { %v421_v59 = vpop.f32.mrf.mxu2  ;;  %v439_v0 = vadd.f32 %v438_v39, %v419_v37 }
 0x1ec   :  { %v478_v42 = vpop.f32.mrf.mxu1 }
 0x1ed   :  { %v479_v48 = vadd.f32 %v478_v42, %v459_v41 }
 0x1ef   :  { %v488_v52 = vsel %vm321_vm0, 1.0, %v479_v48 }
 0x1f0   :  { %v492_v54 = vpack.c.bf16 %v488_v52, %v477_v49  ;;  %v1102_v49 = vld [vmem:[%s1689_s4 + $0x8] sm:$0xff]  ;;  %v1101_v52 = vld [vmem:[%s1689_s4] sm:$0xff] }
 0x1f2   :  { %v440_v60 = vpop.f32.mrf.mxu3  ;;  %538 = vmatpush.bf16.msra.mxu3 %v492_v54 }
 0x1f3   :  { %v441_v61 = vadd.f32 %v440_v60, %v421_v59 }
 0x1f5   :  { %v487_v1 = vsel %vm321_vm0, 1.0, %v441_v61 }
 0x1f6   :  { %v491_v7 = vpack.c.bf16 %v487_v1, %v439_v0  ;;  %539 = vmatpush.bf16.msra.mxu3 %v490_v63 }
 0x1f8   :  { %519 = vmatpush.bf16.msra.mxu2 %v491_v7 }
 0x1f9   :  { %1039 = vmatmul.msk.bf16.vlgmr.msra.gmra.mxu3 %vm348_vm1, %v1099_v2 }
 0x1fa   :  { %620 = vmatpush.bf16.msrb.mxu3 %v1203_v12  ;;  %v1100_v12 = vld [vmem:[%s1688_s3 + $0x8] sm:$0xff] }
 0x1fc   :  { %520 = vmatpush.bf16.msra.mxu2 %v489_v17 }
 0x1fe   :  { %621 = vmatpush.bf16.msrb.mxu3 %v1241_v25 }
 0x1ff   :  { %1037 = vmatmul.msk.bf16.vlgmr.msra.gmra.mxu2 %vm348_vm1, %v1099_v2 }
 0x200   :  { %601 = vmatpush.bf16.msrb.mxu2 %v1191_v8 }
 0x202   :  { %622 = vmatpush.bf16.msrb.mxu3 %v1280_v38 }
 0x204   :  { %602 = vmatpush.bf16.msrb.mxu2 %v1230_v21 }
 0x206   :  { %623 = vmatpush.bf16.msrb.mxu3 %v1316_v50 }
 0x208   :  { %603 = vmatpush.bf16.msrb.mxu2 %v1268_v34 }
 0x209   :  { %1040 = vmatmul.msk.bf16.gmra.mxu3 %vm348_vm1, %v1100_v12 }
 0x20a   :  { %624 = vmatpush.bf16.msrb.mxu3 %v1352_v62 }
 0x20c   :  { %604 = vmatpush.bf16.msrb.mxu2 %v1304_v46 }
 0x20e   :  { %625 = vmatpush.bf16.msrb.mxu3 %v1388_v14 }
 0x20f   :  { %1038 = vmatmul.msk.bf16.gmra.mxu2 %vm348_vm1, %v1100_v12 }
 0x210   :  { %605 = vmatpush.bf16.msrb.mxu2 %v1340_v58 }
 0x212   :  { %626 = vmatpush.bf16.msrb.mxu3 %v1424_v31 }
 0x214   :  { %606 = vmatpush.bf16.msrb.mxu2 %v1376_v9 }
 0x216   :  { %627 = vmatpush.bf16.msrb.mxu3 %v1463_v51 }
 0x218   :  { %607 = vmatpush.bf16.msrb.mxu2 %v1412_v26 }
 0x21c   :  { %608 = vmatpush.bf16.msrb.mxu2 %v1454_v47 }
 0x27c   :  { %v541_v8 = vpop.f32.mrf.mxu3 }
 0x27d   :  { %v552_v34 = vmax.f32 %v541_v8, 0.0 }
 0x282   :  { %v522_v21 = vpop.f32.mrf.mxu2 }
 0x283   :  { %v551_v58 = vmax.f32 %v522_v21, 0.0 }
 0x284   :  { %v543_v25 = vpop.f32.mrf.mxu3 }
 0x285   :  { %v554_v38 = vmax.f32 %v543_v25, 0.0 }
 0x287   :  { %v560_v46 = vpack.c.bf16 %v554_v38, %v552_v34 }
 0x289   :  { %590 = vmatmul.bf16.vlgmr.msrb.gmra.mxu1 %v560_v46  ;;  %628 = vmatmul.bf16.vlgmr.msrb.gmra.mxu3 %v560_v46 }
 0x28a   :  { %v524_v50 = vpop.f32.mrf.mxu2 }
 0x28b   :  { %v553_v62 = vmax.f32 %v524_v50, 0.0 }
 0x28c   :  { %v546_v14 = vpop.f32.mrf.mxu3 }
 0x28d   :  { %v559_v31 = vpack.c.bf16 %v553_v62, %v551_v58  ;;  %v556_v26 = vmax.f32 %v546_v14, 0.0 }
 0x28f   :  { %571 = vmatmul.bf16.vlgmr.msrb.gmra.mxu0 %v559_v31  ;;  %609 = vmatmul.bf16.vlgmr.msrb.gmra.mxu2 %v559_v31 }
 0x292   :  { %v527_v9 = vpop.f32.mrf.mxu2 }
 0x293   :  { %v555_v44 = vmax.f32 %v527_v9, 0.0 }
 0x294   :  { %v548_v51 = vpop.f32.mrf.mxu3 }
 0x295   :  { %v558_v29 = vmax.f32 %v548_v51, 0.0 }
 0x297   :  { %v562_v47 = vpack.c.bf16 %v558_v29, %v556_v26 }
 0x299   :  { %595 = vmatmul.bf16.gmra.mxu1 %v562_v47  ;;  %633 = vmatmul.bf16.gmra.mxu3 %v562_v47 }
 0x29a   :  { %v529_v33 = vpop.f32.mrf.mxu2 }
 0x29b   :  { %v557_v45 = vmax.f32 %v529_v33, 0.0 }
 0x29d   :  { %v561_v56 = vpack.c.bf16 %v557_v45, %v555_v44 }
 0x29f   :  { %576 = vmatmul.bf16.gmra.mxu0 %v561_v56  ;;  %614 = vmatmul.bf16.gmra.mxu2 %v561_v56 }
 0x306   :  { %v591_v57 = vpop.f32.mrf.mxu1 }
 0x30c   :  { %v572_v5 = vpop.f32.mrf.mxu0  ;;  %v629_v6 = vpop.f32.mrf.mxu3 }
 0x30d   :  { %v592_v35 = vadd.f32 %v591_v57, %v572_v5 }
 0x30e   :  { %v593_v23 = vpop.f32.mrf.mxu1 }
 0x312   :  { %v610_v24 = vpop.f32.mrf.mxu2 }
 0x313   :  { %v630_v55 = vadd.f32 %v629_v6, %v610_v24 }
 0x314   :  { %v574_v40 = vpop.f32.mrf.mxu0  ;;  %v631_v43 = vpop.f32.mrf.mxu3 }
 0x315   :  { %v594_v30 = vadd.f32 %v593_v23, %v574_v40 }
 0x316   :  { %v596_v4 = vpop.f32.mrf.mxu1 }
 0x317   :  { %v647_v41 = vpack.c.bf16 %v594_v30, %v592_v35 }
 0x31a   :  { %v612_v10 = vpop.f32.mrf.mxu2 }
 0x31b   :  { %v632_v53 = vadd.f32 %v631_v43, %v612_v10 }
 0x31c   :  { %v577_v11 = vpop.f32.mrf.mxu0  ;;  %v634_v13 = vpop.f32.mrf.mxu3 }
 0x31d   :  { %v597_v22 = vadd.f32 %v596_v4, %v577_v11  ;;  %v648_v27 = vpack.c.bf16 %v632_v53, %v630_v55 }
 0x31e   :  { %v598_v18 = vpop.f32.mrf.mxu1 }
 0x322   :  { %v615_v15 = vpop.f32.mrf.mxu2 }
 0x323   :  { %v635_v42 = vadd.f32 %v634_v13, %v615_v15 }
 0x324   :  { %v579_v19 = vpop.f32.mrf.mxu0  ;;  %v636_v36 = vpop.f32.mrf.mxu3 }
 0x325   :  { %v599_v20 = vadd.f32 %v598_v18, %v579_v19 }
 0x327   :  { %v645_v28 = vsel %vm321_vm0, 1.0, %v599_v20 }
 0x328   :  { %v649_v32 = vpack.c.bf16 %v645_v28, %v597_v22 }
 0x32a   :  { %v617_v37 = vpop.f32.mrf.mxu2  ;;  %677 = vmatpush.bf16.msra.mxu0 %v649_v32  ;;  %1103 = vmatpush.bf16.msra.mxu2 %v649_v32 }
 0x32b   :  { %v637_v39 = vadd.f32 %v636_v36, %v617_v37 }
 0x32d   :  { %v646_v48 = vsel %vm321_vm0, 1.0, %v637_v39 }
 0x32e   :  { %v650_v54 = vpack.c.bf16 %v646_v48, %v635_v42  ;;  %678 = vmatpush.bf16.msra.mxu0 %v647_v41  ;;  %1104 = vmatpush.bf16.msra.mxu2 %v647_v41 }
 0x330   :  { %696 = vmatpush.bf16.msra.mxu1 %v650_v54  ;;  %1105 = vmatpush.bf16.msra.mxu3 %v650_v54 }
 0x331   :  { %1050 = vmatmul.msk.bf16.vlgmr.msra.gmra.mxu2 %vm348_vm1, %v1102_v49  ;;  %1049 = vmatmul.msk.bf16.vlgmr.msra.gmra.mxu0 %vm348_vm1, %v1101_v52 }
 0x334   :  { %697 = vmatpush.bf16.msra.mxu1 %v648_v27  ;;  %1106 = vmatpush.bf16.msra.mxu3 %v648_v27 }
 0x337   :  { %1052 = vmatmul.msk.bf16.vlgmr.msra.gmra.mxu3 %vm348_vm1, %v1102_v49  ;;  %1051 = vmatmul.msk.bf16.vlgmr.msra.gmra.mxu1 %vm348_vm1, %v1101_v52 }
 0x3ae   :  { %v680_v59 = vpop.f32.mrf.mxu0 }
 0x3af   :  { %v1053_v60 = vmul.f32 -1.442695, %v680_v59 }
 0x3b1   :  { %1107 = vpow2.f32 %v1053_v60 }
 0x3b4   :  { %v685_v61 = vpop.f32.mrf.mxu2  ;;  %v699_v63 = vpop.f32.mrf.mxu1 }
 0x3b5   :  { %v1057_v0 = vmul.f32 -1.442695, %v685_v61  ;;  %v1054_v1 = vmul.f32 -1.442695, %v699_v63 }
 0x3b6   :  { %v682_v2 = vpop.f32.mrf.mxu0 }
 0x3b7   :  { %v1108_v3 = vpop.eup %1107  ;;  %1109 = vpow2.f32 %v1057_v0  ;;  %v1055_v7 = vmul.f32 -1.442695, %v682_v2 }
 0x3b8   :  { %v733_v16 = vadd.f32 1.0, %v1108_v3  ;;  %1111 = vpow2.f32 %v1054_v1 }
 0x3b9   :  { %1113 = vpow2.f32 %v1055_v7 }
 0x3ba   :  { %1115 = vrcp.f32 %v733_v16  ;;  %v704_v17 = vpop.f32.mrf.mxu3  ;;  %vm746_vm2 = vweird.f32 %v733_v16  ;;  %v750_v9 = vand.u32 2147483647, %v733_v16  ;;  %v752_v51 = vand.u32 2147483648, %v733_v16 }
 0x3bb   :  { %v1058_v12 = vmul.f32 -1.442695, %v704_v17 }
 0x3bc   :  { %v687_v8 = vpop.f32.mrf.mxu2  ;;  %v701_v21 = vpop.f32.mrf.mxu1  ;;  %vm1607_vm5 = vcmp.eq.f32.partialorder %v750_v9, 8.507059e+37  ;;  %v753_v24 = vor.u32 1.1754944e-38, %v752_v51 }
 0x3bd   :  { %v1110_v25 = vpop.eup %1109  ;;  %1117 = vpow2.f32 %v1058_v12  ;;  %v1059_v34 = vmul.f32 -1.442695, %v687_v8  ;;  %v1056_v62 = vmul.f32 -1.442695, %v701_v21 }
 0x3be   :  { %v1112_v38 = vpop.eup %1111  ;;  %v1590_v46 = vadd.f32 1.0, %v1110_v25 }
 0x3bf   :  { %v1114_v50 = vpop.eup %1113  ;;  %v1592_v58 = vadd.f32 1.0, %v1112_v38  ;;  %1119 = vpow2.f32 %v1059_v34 }
 0x3c0   :  { %v1116_v14 = vpop.eup %1115  ;;  %1121 = vrcp.f32 %v1590_v46  ;;  %v1596_v47 = vadd.f32 1.0, %v1114_v50  ;;  %v810_v44 = vand.u32 2147483647, %v1590_v46  ;;  %vm806_vm6 = vweird.f32 %v1590_v46 }
 0x3c1   :  { %v742_v31 = vmul.f32 %v1116_v14, %v733_v16  ;;  %1123 = vrcp.f32 %v1592_v58  ;;  %vm747_vm3 = vweird.f32 %v1116_v14  ;;  %v812_v11 = vand.u32 2147483648, %v1590_v46 }
 0x3c2   :  { %1125 = vpow2.f32 %v1056_v62  ;;  %v706_v33 = vpop.f32.mrf.mxu3  ;;  %vm1603_vm4 = vmor %vm746_vm2, %vm747_vm3  ;;  %vm1615_vm7 = vcmp.eq.f32.partialorder %v810_v44, 8.507059e+37  ;;  %vm761_vm8 = vweird.f32 %v1592_v58  ;;  %v765_v18 = vand.u32 2147483647, %v1592_v58 }
 0x3c3   :  { %v1118_v26 = vpop.eup %1117  ;;  %v743_v29 = vsub.f32 1.0, %v742_v31  ;;  %1127 = vrcp.f32 %v1596_v47  ;;  %v1060_v40 = vmul.f32 -1.442695, %v706_v33  ;;  %v767_v28 = vand.u32 2147483648, %v1592_v58 }
 0x3c4   :  { %v1599_v45 = vadd.f32 1.0, %v1118_v26  ;;  %v813_v41 = vor.u32 1.1754944e-38, %v812_v11  ;;  %vm1635_vm11 = vcmp.eq.f32.partialorder %v765_v18, 8.507059e+37  ;;  %v780_v27 = vand.u32 2147483647, %v1596_v47 }
 0x3c5   :  { %v1120_v56 = vpop.eup %1119  ;;  %v744_v57 = vmul.f32 %v1116_v14, %v743_v29  ;;  %v768_v54 = vor.u32 1.1754944e-38, %v767_v28  ;;  %v782_v2 = vand.u32 2147483648, %v1596_v47  ;;  %vm776_vm1 = vweird.f32 %v1596_v47 }
 0x3c6   :  { %v1122_v5 = vpop.eup %1121  ;;  %1129 = vrcp.f32 %v1599_v45  ;;  %v1625_v30 = vadd.f32 1.0, %v1120_v56  ;;  %v825_v60 = vand.u32 2147483647, %v1599_v45  ;;  %v827_v1 = vand.u32 2147483648, %v1599_v45 }
 0x3c7   :  { %v1124_v43 = vpop.eup %1123  ;;  %v745_v4 = vadd.f32 %v1116_v14, %v744_v57  ;;  %v802_v10 = vmul.f32 %v1122_v5, %v1590_v46  ;;  %1131 = vpow2.f32 %v1060_v40  ;;  %vm807_vm9 = vweird.f32 %v1122_v5 }
 0x3c8   :  { %v757_v15 = vmul.f32 %v1124_v43, %v1592_v58  ;;  %v1126_v19 = vpop.eup %1125  ;;  %1133 = vrcp.f32 %v1625_v30  ;;  %vm762_vm10 = vweird.f32 %v1124_v43  ;;  %vm808_vm12 = vmor %vm806_vm6, %vm807_vm9  ;;  %vm821_vm0 = vweird.f32 %v1599_v45 }
 0x3c9   :  { %v749_v20 = vsel %vm1603_vm4, %v1116_v14, %v745_v4  ;;  %v803_v22 = vsub.f32 1.0, %v802_v10  ;;  %v1629_v36 = vadd.f32 1.0, %v1126_v19  ;;  %v1128_v37 = vpop.eup %1127  ;;  %vm763_vm13 = vmor %vm761_vm8, %vm762_vm10  ;;  %vm781_vm3 = vcmp.eq.f32.partialorder %v780_v27, 8.507059e+37 }
 0x3ca   :  { %v754_v32 = vsel %vm1607_vm5, %v753_v24, %v749_v20  ;;  %v758_v35 = vsub.f32 1.0, %v757_v15  ;;  %v772_v52 = vmul.f32 %v1128_v37, %v1596_v47  ;;  %vm777_vm14 = vweird.f32 %v1128_v37 }
 0x3cb   :  { %861 = vst [vmem:[%s1690_s5] sm:$0xff] %v754_v32  ;;  %v804_v39 = vmul.f32 %v1122_v5, %v803_v22  ;;  %1135 = vrcp.f32 %v1629_v36  ;;  %vm778_vm2 = vmor %vm776_vm1, %vm777_vm14  ;;  %v783_v50 = vor.u32 1.1754944e-38, %v782_v2  ;;  %vm826_vm5 = vcmp.eq.f32.partialorder %v825_v60, 8.507059e+37 }
 0x3cc   :  { %v1130_v42 = vpop.eup %1129  ;;  %v759_v48 = vmul.f32 %v1124_v43, %v758_v35  ;;  %v773_v61 = vsub.f32 1.0, %v772_v52  ;;  %v828_v62 = vor.u32 1.1754944e-38, %v827_v1  ;;  %v842_v26 = vand.u32 2147483648, %v1625_v30 }
 0x3cd   :  { %v805_v53 = vadd.f32 %v1122_v5, %v804_v39  ;;  %v817_v55 = vmul.f32 %v1130_v42, %v1599_v45  ;;  %v1132_v3 = vpop.eup %1131  ;;  %vm822_vm15 = vweird.f32 %v1130_v42  ;;  %v840_v44 = vand.u32 2147483647, %v1625_v30 }
 0x3ce   :  { %v760_v59 = vadd.f32 %v1124_v43, %v759_v48  ;;  %v774_v17 = vmul.f32 %v1128_v37, %v773_v61  ;;  %v1134_v12 = vpop.eup %1133  ;;  %v740_v25 = vadd.f32 1.0, %v1132_v3  ;;  %vm823_vm4 = vmor %vm821_vm0, %vm822_vm15  ;;  %v797_v57 = vand.u32 2147483648, %v1629_v36 }
 0x3cf   :  { %v809_v63 = vsel %vm808_vm12, %v1122_v5, %v805_v53  ;;  %v818_v0 = vsub.f32 1.0, %v817_v55  ;;  %v832_v38 = vmul.f32 %v1134_v12, %v1625_v30  ;;  %vm837_vm6 = vweird.f32 %v1134_v12 }
 0x3d0   :  { %v814_v7 = vsel %vm1615_vm7, %v813_v41, %v809_v63  ;;  %v764_v16 = vsel %vm763_vm13, %v1124_v43, %v760_v59  ;;  %v775_v34 = vadd.f32 %v1128_v37, %v774_v17  ;;  %1137 = vrcp.f32 %v740_v25 }
 0x3d1   :  { %865 = vst [vmem:[%s1690_s5 + $0x20] sm:$0xff] %v814_v7  ;;  %v769_v8 = vsel %vm1635_vm11, %v768_v54, %v764_v16  ;;  %v819_v21 = vmul.f32 %v1130_v42, %v818_v0  ;;  %v1136_v58 = vpop.eup %1135  ;;  %v833_v31 = vsub.f32 1.0, %v832_v38  ;;  %vm836_vm7 = vweird.f32 %v1625_v30 }
 0x3d2   :  { %862 = vst [vmem:[%s1690_s5 + $0x8] sm:$0xff] %v769_v8  ;;  %v779_v14 = vsel %vm778_vm2, %v1128_v37, %v775_v34  ;;  %v787_v29 = vmul.f32 %v1136_v58, %v1629_v36  ;;  %vm838_vm8 = vmor %vm836_vm7, %vm837_vm6  ;;  %v843_v6 = vor.u32 1.1754944e-38, %v842_v26  ;;  %vm792_vm9 = vweird.f32 %v1136_v58 }
 0x3d3   :  { %v820_v46 = vadd.f32 %v1130_v42, %v819_v21  ;;  %v784_v51 = vsel %vm781_vm3, %v783_v50, %v779_v14  ;;  %v834_v33 = vmul.f32 %v1134_v12, %v833_v31  ;;  %v795_v24 = vand.u32 2147483647, %v1629_v36 }
 0x3d4   :  { %863 = vst [vmem:[%s1690_s5 + $0x10] sm:$0xff] %v784_v51  ;;  %v788_v45 = vsub.f32 1.0, %v787_v29  ;;  %vm841_vm10 = vcmp.eq.f32.partialorder %v840_v44, 8.507059e+37  ;;  %vm791_vm11 = vweird.f32 %v1629_v36  ;;  %v798_v11 = vor.u32 1.1754944e-38, %v797_v57 }
 0x3d5   :  { %v824_v9 = vsel %vm823_vm4, %v1130_v42, %v820_v46  ;;  %v835_v56 = vadd.f32 %v1134_v12, %v834_v33  ;;  %vm793_vm12 = vmor %vm791_vm11, %vm792_vm9  ;;  %vm796_vm13 = vcmp.eq.f32.partialorder %v795_v24, 8.507059e+37  ;;  %v857_v18 = vand.u32 2147483648, %v740_v25 }
 0x3d6   :  { %v829_v47 = vsel %vm826_vm5, %v828_v62, %v824_v9  ;;  %v1138_v5 = vpop.eup %1137  ;;  %v789_v23 = vmul.f32 %v1136_v58, %v788_v45  ;;  %v855_v22 = vand.u32 2147483647, %v740_v25  ;;  %vm851_vm15 = vweird.f32 %v740_v25 }
 0x3d7   :  { %866 = vst [vmem:[%s1690_s5 + $0x28] sm:$0xff] %v829_v47  ;;  %v839_v40 = vsel %vm838_vm8, %v1134_v12, %v835_v56  ;;  %v847_v43 = vmul.f32 %v1138_v5, %v740_v25  ;;  %vm852_vm14 = vweird.f32 %v1138_v5  ;;  %v858_v30 = vor.u32 1.1754944e-38, %v857_v18 }
 0x3d8   :  { %v844_v4 = vsel %vm841_vm10, %v843_v6, %v839_v40  ;;  %v790_v10 = vadd.f32 %v1136_v58, %v789_v23  ;;  %vm853_vm0 = vmor %vm851_vm15, %vm852_vm14  ;;  %vm856_vm1 = vcmp.eq.f32.partialorder %v855_v22, 8.507059e+37 }
 0x3d9   :  { %867 = vst [vmem:[%s1690_s5 + $0x30] sm:$0xff] %v844_v4  ;;  %v848_v13 = vsub.f32 1.0, %v847_v43 }
 0x3da   :  { %v794_v15 = vsel %vm793_vm12, %v1136_v58, %v790_v10 }
 0x3db   :  { %v799_v19 = vsel %vm796_vm13, %v798_v11, %v794_v15  ;;  %v849_v20 = vmul.f32 %v1138_v5, %v848_v13 }
 0x3dc   :  { %864 = vst [vmem:[%s1690_s5 + $0x18] sm:$0xff] %v799_v19 }
 0x3dd   :  { %v850_v28 = vadd.f32 %v1138_v5, %v849_v20 }
 0x3df   :  { %v854_v32 = vsel %vm853_vm0, %v1138_v5, %v850_v28 }
 0x3e0   :  { %v859_v35 = vsel %vm856_vm1, %v858_v30, %v854_v32 }
 0x3e1   :  { %868 = vst [vmem:[%s1690_s5 + $0x38] sm:$0xff] %v859_v35 }

</bundles_post_ra>
